<compile_context>
chip_gen: v7x
topology: tpu7x:2x2x1
jax: 0.10.0
libtpu: 0.0.40
codegen_flags: <defaults>
</compile_context>

<pallas_src>
import functools

import jax
import jax.numpy as jnp
from jax.experimental import pallas as pl
from jax.experimental.pallas import tpu as pltpu

_LANE = 128      # TPU lane width (last vreg dim)
_SUBLANE = 8     # f32 sublane width (second-to-last vreg dim)
_M_TILE = 128    # batch tile used once the batch is big enough to shard across cores


def _round_up(n, m):
    return ((n + m - 1) // m) * m


def _vmem_capacity_bytes():
    """Per-generation VMEM capacity; conservative fallback if the query fails."""
    try:
        cap = int(pltpu.get_tpu_info().vmem_capacity_bytes)
        if cap > 0:
            return cap
    except Exception:
        pass
    return 64 * 1024 * 1024  # v7x physical VMEM (smallest of the three generations)


def _fused_mlp_kernel(*refs, num_layers):
    """refs = (x, w1, b1, w2, b2, ..., wL, bL, out); whole-(block) VMEM views.

    Matmul operands are in the prepared weight dtype (bf16 by default) -> native
    MXU path with f32 accumulation. Bias add + ReLU epilogue runs in f32 on the
    VPU; only the next matmul's LHS is downcast back to the weight dtype.
    """
    x_ref = refs[0]
    o_ref = refs[-1]
    wb_refs = refs[1:-1]

    h = x_ref[...]                                   # matmul-operand dtype (bf16)
    for i in range(num_layers):
        w = wb_refs[2 * i][...]
        b = wb_refs[2 * i + 1][...]                  # f32 (1, N): broadcasts over rows
        acc = jnp.dot(h, w, preferred_element_type=jnp.float32) + b
        if i < num_layers - 1:
            acc = jnp.maximum(acc, 0.0)              # f32 epilogue
            # TODO(synk): nn.Dropout(p=0.5) is identity in eval mode; training-mode
            # stochastic dropout (pltpu.prng_random_bits mask) is not emitted here.
            h = acc.astype(w.dtype)                  # downcast only the MXU operand
        else:
            o_ref[...] = acc.astype(o_ref.dtype)


def init_mlp_params(key, input_dim, layer_sizes, num_classes=2):
    """Deterministic init mimicking nn.Linear default (uniform +/- 1/sqrt(fan_in)).

    Weights stored as (in_features, out_features) so the kernel computes y = x @ W + b.
    """
    params = []
    dims = [input_dim] + list(layer_sizes) + [num_classes]
    for i in range(len(dims) - 1):
        fan_in, fan_out = dims[i], dims[i + 1]
        key, kw, kb = jax.random.split(key, 3)
        bound = 1.0 / jnp.sqrt(fan_in)
        w = jax.random.uniform(kw, (fan_in, fan_out), jnp.float32, -bound, bound)
        b = jax.random.uniform(kb, (fan_out,), jnp.float32, -bound, bound)
        params.append((w, b))
    return params


def prepare_fused_params(params, weight_dtype=jnp.bfloat16):
    """One-time layout prep for the fused kernel (hoisted out of the forward pass).

    Every layer's output width is zero-padded up to a multiple of 128 so all
    intermediate activations and the final output are lane-dense (unmasked stores).
    This is exact: padded units have zero weight/bias (-> 0 activations), and the
    next layer's matching padded input rows multiply those zeros. Weights are cast
    to `weight_dtype` (bf16 default: halves weight DMA bytes, native MXU path);
    biases stay f32 and are reshaped to (1, N) once (f32 epilogue).
    """
    prepared = []
    prev_out_pad = _round_up(params[0][0].shape[0], _LANE) - params[0][0].shape[0]
    for w, b in params:
        _, n = w.shape
        n_pad = _round_up(n, _LANE) - n
        w = jnp.pad(w, ((0, prev_out_pad), (0, n_pad))).astype(weight_dtype)
        b = jnp.pad(b, (0, n_pad)).reshape(1, -1).astype(jnp.float32)
        prepared.append((w, b))
        prev_out_pad = n_pad
    return prepared


def fused_mlp_forward(prepared_params, x, num_classes):
    """Forward pass matching the PyTorch MLP (eval mode), as ONE pallas_call."""
    if x.ndim > 2:
        x = x.reshape(x.shape[0], -1)          # torch.flatten(x, start_dim=1)
    batch, in_dim = x.shape

    in_dim_padded = prepared_params[0][0].shape[0]
    out_padded = prepared_params[-1][0].shape[1]
    num_layers = len(prepared_params)
    flat_wb = [t for wb in prepared_params for t in wb]
    weight_dtype = prepared_params[0][0].dtype

    # Tiny batches: one grid-free call (no per-step overhead). Large batches: tile
    # the batch axis and mark it "parallel" so v7x's two TensorCores share the work.
    use_grid = batch > _M_TILE
    m_tile = _M_TILE if use_grid else _round_up(batch, _SUBLANE)
    batch_padded = _round_up(batch, m_tile)

    # Pad batch and features; padded rows are sliced away below and padded feature
    # columns hit zero weight rows, so the result is exact.
    x = jnp.pad(x, ((0, batch_padded - batch), (0, in_dim_padded - in_dim)))
    x = x.astype(weight_dtype)

    # --- generation-aware VMEM budget / limit --------------------------------
    itemsize_w = jnp.dtype(weight_dtype).itemsize
    weight_bytes = sum(int(t.size) * t.dtype.itemsize for t in flat_wb)
    x_tile_bytes = m_tile * in_dim_padded * itemsize_w
    out_tile_bytes = m_tile * out_padded * 4
    act_bytes = m_tile * max(w.shape[1] for w, _ in prepared_params) * 4
    # 2x on pipelined I/O tiles (double buffering) + 2x activation headroom.
    footprint = weight_bytes + 2 * (x_tile_bytes + out_tile_bytes) + 2 * act_bytes

    vmem_cap = _vmem_capacity_bytes()
    vmem_budget = int(0.8 * vmem_cap)              # leave room for compiler scratch
    assert footprint < vmem_budget, (
        "fused MLP does not fit VMEM on this TPU generation; "
        "use a layer-wise M/N/K-tiled GEMM instead")
    vmem_limit = int(min(vmem_budget, max(4 * footprint, 32 * 1024 * 1024)))

    # --- advisory cost estimate for the XLA scheduler -------------------------
    flops = 0
    k = in_dim_padded
    for w, _ in prepared_params:
        flops += 2 * batch_padded * k * w.shape[1]
        k = w.shape[1]
    bytes_accessed = (batch_padded * in_dim_padded * itemsize_w
                      + weight_bytes
                      + batch_padded * out_padded * 4)
    cost = pl.CostEstimate(flops=flops, transcendentals=0,
                           bytes_accessed=bytes_accessed)

    kernel = functools.partial(_fused_mlp_kernel, num_layers=num_layers)
    out_shape = jax.ShapeDtypeStruct((batch_padded, out_padded), jnp.float32)

    if not use_grid:
        vmem_spec = pl.BlockSpec(memory_space=pltpu.MemorySpace.VMEM)
        out = pl.pallas_call(
            kernel,
            out_shape=out_shape,
            in_specs=[vmem_spec] * (1 + len(flat_wb)),
            out_specs=vmem_spec,
            compiler_params=pltpu.CompilerParams(vmem_limit_bytes=vmem_limit),
            cost_estimate=cost,
        )(x, *flat_wb)
    else:
        row_map = lambda i: (i, 0)
        const_map = lambda i: (0, 0)
        in_specs = [pl.BlockSpec((m_tile, in_dim_padded), row_map)]
        for t in flat_wb:
            in_specs.append(pl.BlockSpec(t.shape, const_map))  # weights stay resident
        out_specs = pl.BlockSpec((m_tile, out_padded), row_map)
        out = pl.pallas_call(
            kernel,
            out_shape=out_shape,
            grid=(batch_padded // m_tile,),
            in_specs=in_specs,
            out_specs=out_specs,
            compiler_params=pltpu.CompilerParams(
                dimension_semantics=("parallel",),
                vmem_limit_bytes=vmem_limit),
            cost_estimate=cost,
        )(x, *flat_wb)

    # Drop batch / lane padding (classifier head was padded num_classes -> 128).
    return out[:batch, :num_classes]


def _ref_forward_bf16(params, xf, weight_dtype=jnp.bfloat16):
    """Plain-JAX reference mirroring the kernel's bf16-operand / f32-accum math."""
    h = xf.astype(weight_dtype)
    for i, (w, b) in enumerate(params):
        acc = jnp.dot(h, w.astype(weight_dtype),
                      preferred_element_type=jnp.float32) + b.astype(jnp.float32)
        if i < len(params) - 1:
            acc = jnp.maximum(acc, 0.0)
            h = acc.astype(weight_dtype)
        else:
            return acc


def _ref_forward_f32(params, xf):
    h = xf
    for w, b in params[:-1]:
        h = jnp.maximum(h @ w + b, 0.0)
    return h @ params[-1][0] + params[-1][1]


if __name__ == "__main__":
    key = jax.random.PRNGKey(0)
    k_params, k_x, k_x_big = jax.random.split(key, 3)

    # Small shapes implied by the module: image-like input flattened to input_dim.
    B, C, H, W = 2, 4, 16, 16
    input_dim = C * H * W            # 1024
    layer_sizes = [256, 128]
    num_classes = 2

    params = init_mlp_params(k_params, input_dim, layer_sizes, num_classes)
    # One-time layout prep (bf16 weights, lane padding, (1, N) f32 biases).
    prepared = prepare_fused_params(params, weight_dtype=jnp.bfloat16)

    fwd = jax.jit(functools.partial(fused_mlp_forward, num_classes=num_classes))

    # --- small batch: grid-free fused path ------------------------------------
    x = jax.random.normal(k_x, (B, C, H, W), jnp.float32)
    out = jax.block_until_ready(fwd(prepared, x))
    assert out.shape == (B, num_classes), out.shape
    assert out.dtype == jnp.float32

    xf = x.reshape(B, -1)
    ref_bf16 = _ref_forward_bf16(params, xf)
    ref_f32 = _ref_forward_f32(params, xf)
    assert jnp.allclose(out, ref_bf16, atol=2e-3, rtol=2e-3), "bf16-path mismatch"
    assert jnp.allclose(out, ref_f32, atol=5e-2, rtol=5e-2), "f32 semantics mismatch"

    # --- larger batch: M-tiled 'parallel' grid (v7x megacore) path -------------
    B_big = 512
    x_big = jax.random.normal(k_x_big, (B_big, input_dim), jnp.float32)
    out_big = jax.block_until_ready(fwd(prepared, x_big))
    assert out_big.shape == (B_big, num_classes), out_big.shape
    ref_big = _ref_forward_bf16(params, x_big)
    assert jnp.allclose(out_big, ref_big, atol=2e-3, rtol=2e-3), "gridded-path mismatch"

    print("KERNEL_OK")
</pallas_src>

<mosaic_0001>
module attributes {stable_mosaic.version = 11 : i64} {
  func.func @_fused_mlp_kernel(%arg0: memref<8x1024xbf16, #tpu.memory_space<vmem>>, %arg1: memref<1024x256xbf16, #tpu.memory_space<vmem>>, %arg2: memref<1x256xf32, #tpu.memory_space<vmem>>, %arg3: memref<256x128xbf16, #tpu.memory_space<vmem>>, %arg4: memref<1x128xf32, #tpu.memory_space<vmem>>, %arg5: memref<128x128xbf16, #tpu.memory_space<vmem>>, %arg6: memref<1x128xf32, #tpu.memory_space<vmem>>, %arg7: memref<8x128xf32, #tpu.memory_space<vmem>>) attributes {dimension_semantics = [], scalar_prefetch = 0 : i64, scratch_operands = 0 : i64, tpu.core_type = #tpu.core_type<tc>} {
    %c0 = arith.constant 0 : index
    %c0_0 = arith.constant 0 : index
    %0 = vector.load %arg0[%c0, %c0_0] : memref<8x1024xbf16, #tpu.memory_space<vmem>>, vector<8x1024xbf16>
    %c0_1 = arith.constant 0 : index
    %c0_2 = arith.constant 0 : index
    %1 = vector.load %arg1[%c0_1, %c0_2] : memref<1024x256xbf16, #tpu.memory_space<vmem>>, vector<1024x256xbf16>
    %c0_3 = arith.constant 0 : index
    %c0_4 = arith.constant 0 : index
    %2 = vector.load %arg2[%c0_3, %c0_4] : memref<1x256xf32, #tpu.memory_space<vmem>>, vector<1x256xf32>
    %cst = arith.constant dense<0.000000e+00> : vector<8x256xf32>
    %3 = tpu.matmul %0, %1, %cst {dimension_numbers = #tpu.dot_dimension_numbers<[1], [0], [0], [1], [0, 0, 1, 1], [], []>} : vector<8x1024xbf16>, vector<1024x256xbf16>, vector<8x256xf32> -> vector<8x256xf32>
    %4 = vector.broadcast %2 : vector<1x256xf32> to vector<8x256xf32>
    %5 = arith.addf %3, %4 : vector<8x256xf32>
    %cst_5 = arith.constant 0.000000e+00 : f32
    %6 = vector.broadcast %cst_5 : f32 to vector<8x256xf32>
    %7 = arith.maximumf %5, %6 : vector<8x256xf32>
    %8 = arith.truncf %7 : vector<8x256xf32> to vector<8x256xbf16>
    %c0_6 = arith.constant 0 : index
    %c0_7 = arith.constant 0 : index
    %9 = vector.load %arg3[%c0_6, %c0_7] : memref<256x128xbf16, #tpu.memory_space<vmem>>, vector<256x128xbf16>
    %c0_8 = arith.constant 0 : index
    %c0_9 = arith.constant 0 : index
    %10 = vector.load %arg4[%c0_8, %c0_9] : memref<1x128xf32, #tpu.memory_space<vmem>>, vector<1x128xf32>
    %cst_10 = arith.constant dense<0.000000e+00> : vector<8x128xf32>
    %11 = tpu.matmul %8, %9, %cst_10 {dimension_numbers = #tpu.dot_dimension_numbers<[1], [0], [0], [1], [0, 0, 1, 1], [], []>} : vector<8x256xbf16>, vector<256x128xbf16>, vector<8x128xf32> -> vector<8x128xf32>
    %12 = vector.broadcast %10 : vector<1x128xf32> to vector<8x128xf32>
    %13 = arith.addf %11, %12 : vector<8x128xf32>
    %cst_11 = arith.constant 0.000000e+00 : f32
    %14 = vector.broadcast %cst_11 : f32 to vector<8x128xf32>
    %15 = arith.maximumf %13, %14 : vector<8x128xf32>
    %16 = arith.truncf %15 : vector<8x128xf32> to vector<8x128xbf16>
    %c0_12 = arith.constant 0 : index
    %c0_13 = arith.constant 0 : index
    %17 = vector.load %arg5[%c0_12, %c0_13] : memref<128x128xbf16, #tpu.memory_space<vmem>>, vector<128x128xbf16>
    %c0_14 = arith.constant 0 : index
    %c0_15 = arith.constant 0 : index
    %18 = vector.load %arg6[%c0_14, %c0_15] : memref<1x128xf32, #tpu.memory_space<vmem>>, vector<1x128xf32>
    %cst_16 = arith.constant dense<0.000000e+00> : vector<8x128xf32>
    %19 = tpu.matmul %16, %17, %cst_16 {dimension_numbers = #tpu.dot_dimension_numbers<[1], [0], [0], [1], [0, 0, 1, 1], [], []>} : vector<8x128xbf16>, vector<128x128xbf16>, vector<8x128xf32> -> vector<8x128xf32>
    %20 = vector.broadcast %18 : vector<1x128xf32> to vector<8x128xf32>
    %21 = arith.addf %19, %20 : vector<8x128xf32>
    %c0_17 = arith.constant 0 : index
    %c0_18 = arith.constant 0 : index
    %22 = vector.load %arg7[%c0_17, %c0_18] : memref<8x128xf32, #tpu.memory_space<vmem>>, vector<8x128xf32>
    tpu.vector_store %arg7[%c0_17, %c0_18], %21 {strides = array<i32>} : memref<8x128xf32, #tpu.memory_space<vmem>>, vector<8x128xf32>,
    return
  }
}

</mosaic_0001>

<bundles_post_ra>
// kernel: fused_mlp_forward.1
= control target key start
LH: loop header
LB: loop body
LE: loop exit
PB: predicated region body
PF: predicated region fallthrough
CT: control target
= control target key end

     0   :  { %12 = vsyncpa [#allocation3], 0  ;;  %s1793_s24 = smov [#allocation2]   ;;  %s1964_s0 = inlined_call_operand.vmem [shape: bf16[8,1024], index: 0, kind: input, shape index: {}]   ;;  %s1965_s1 = inlined_call_operand.hbm [shape: bf16[1024,256], index: 1, kind: input, shape index: {}]   ;;  %s1966_s2 = inlined_call_operand.vmem [shape: f32[1,256], index: 2, kind: input, shape index: {}]   ;;  %s1967_s3 = inlined_call_operand.vmem [shape: bf16[256,128], index: 3, kind: input, shape index: {}]   ;;  %s1968_s4 = inlined_call_operand.vmem [shape: f32[1,128], index: 4, kind: input, shape index: {}]   ;;  %s1969_s5 = inlined_call_operand.vmem [shape: bf16[128,128], index: 5, kind: input, shape index: {}]   ;;  %s1970_s6 = inlined_call_operand.vmem [shape: f32[1,128], index: 6, kind: input, shape index: {}]   ;;  %s1971_s7 = inlined_call_operand.vmem [shape: f32[8,128], index: 7, kind: output, shape index: {}]  }
   0x1   :  { %s20_s25 = sshll.u32 %s1793_s24, 4  ;;  %s1769_s28 = scalar_lea.hbm %s1965_s1, 16384  ;;  %s21_s25 = int_to_ptr.vmem [resolvable:$true] %s20_s25 }
   0x2   :  { %p1770_p0 = scmp.ne.s32.totalorder %s1965_s1, %s1769_s28  ;;  %p1773_p1 = scmp.lt.u32.totalorder %s1769_s28, %s1965_s1 }
   0x4   :  { %p1775_p2 = pnand %p1773_p1, %p1770_p0 }
   0x6   :  { %1778 = shalt.err (!%p1775_p2)
}
   0x7   :  { %s1779_s10 = scalar_lea.vmem %s21_s25, 16384  ;;  %p1784_p4 = scmp.lt.s32.totalorder %s21_s25, %s21_s25 }
   0x8   :  { %p1780_p3 = scmp.ne.s32.totalorder %s21_s25, %s1779_s10  ;;  %p1785_p5 = scmp.lt.s32.totalorder %s1779_s10, %s1779_s10 }
   0xa   :  { %p1786_p6 = por %p1785_p5, %p1784_p4 }
   0xc   :  { %p1787_p7 = pnand %p1786_p6, %p1780_p3 }
   0xe   :  { %1790 = shalt.err (!%p1787_p7)
}
   0xf   :  { %s1794_s11 = smov 128   ;;  %s1795_s12 = smov 8  }
  0x10   :  { %26 = dma.hbm_to_vmem [thread:$0]  %s1965_s1, 16384, %s21_s25, [#allocation3], %s1794_s11, %s1794_s11, %s1795_s12  }
  0x11   :  { %1791 = dma.done.wait [#allocation3], 16384  }
  0x12   :  { %1792 = vsyncadd [#allocation3], 4294950912  ;;  %v1545_v0 = vld [vmem:[#allocation2 + $0x104] ss:$8 sps:$4 sm:$0xff]   ;;  %v1547_v1 = vld [vmem:[#allocation2 + $0x100] ss:$8 sps:$4 sm:$0xff]  }
  0x13   :  { %894 = vmatprep.subr.bf16.mxu0 %v1545_v0  ;;  %v1548_v2 = vld [vmem:[#allocation2 + $0x114] ss:$8 sps:$4 sm:$0xff]   ;;  %v1550_v3 = vld [vmem:[#allocation2 + $0x110] ss:$8 sps:$4 sm:$0xff]   ;;  %v1551_v4 = vld [vmem:[#allocation2 + $0x124] ss:$8 sps:$4 sm:$0xff]  }
  0x14   :  { %895 = vmatpush1.bf16.msra.mxu0 %v1547_v1  ;;  %v1553_v5 = vld [vmem:[#allocation2 + $0x120] ss:$8 sps:$4 sm:$0xff]   ;;  %v1554_v6 = vld [vmem:[#allocation2 + $0x134] ss:$8 sps:$4 sm:$0xff]   ;;  %v1556_v7 = vld [vmem:[#allocation2 + $0x130] ss:$8 sps:$4 sm:$0xff]  }
  0x15   :  { %896 = vmatprep.subr.bf16.mxu0 %v1548_v2  ;;  %v1557_v8 = vld [vmem:[#allocation2 + $0x144] ss:$8 sps:$4 sm:$0xff]   ;;  %v1559_v9 = vld [vmem:[#allocation2 + $0x140] ss:$8 sps:$4 sm:$0xff]   ;;  %v1560_v10 = vld [vmem:[#allocation2 + $0x154] ss:$8 sps:$4 sm:$0xff]  }
  0x16   :  { %v1562_v11 = vld [vmem:[#allocation2 + $0x150] ss:$8 sps:$4 sm:$0xff]   ;;  %v1563_v12 = vld [vmem:[#allocation2 + $0x164] ss:$8 sps:$4 sm:$0xff]   ;;  %v1565_v15 = vld [vmem:[#allocation2 + $0x160] ss:$8 sps:$4 sm:$0xff]  }
  0x17   :  { %v1853_v13 = vld [vmem:[%s1964_s0 + $0x8] sm:$0xff]  ;;  %v1566_v16 = vld [vmem:[#allocation2 + $0x174] ss:$8 sps:$4 sm:$0xff]   ;;  %v1568_v17 = vld [vmem:[#allocation2 + $0x170] ss:$8 sps:$4 sm:$0xff]   ;;  %vm1797_vm0 = vmmov 0  }
  0x18   :  { %897 = vmatpush1.bf16.msra.mxu0 %v1550_v3  ;;  %v1318_v14 = vcombine.high %v1853_v13, %v1853_v13  ;;  %v1569_v18 = vld [vmem:[#allocation2 + $0x184] ss:$8 sps:$4 sm:$0xff]   ;;  %v1571_v19 = vld [vmem:[#allocation2 + $0x180] ss:$8 sps:$4 sm:$0xff]   ;;  %v1572_v20 = vld [vmem:[#allocation2 + $0x194] ss:$8 sps:$4 sm:$0xff]   ;;  %v1317_v48 = vcombine.low %v1853_v13, %v1853_v13 }
  0x19   :  { %898 = vmatprep.subr.bf16.mxu0 %v1551_v4  ;;  %v1574_v21 = vld [vmem:[#allocation2 + $0x190] ss:$8 sps:$4 sm:$0xff]   ;;  %v1575_v22 = vld [vmem:[#allocation2 + $0x1a4] ss:$8 sps:$4 sm:$0xff]   ;;  %v1577_v23 = vld [vmem:[#allocation2 + $0x1a0] ss:$8 sps:$4 sm:$0xff]  }
  0x1a   :  { %926 = vmatprep.mubr.bf16.mxu0 %v1318_v14  ;;  %v1578_v24 = vld [vmem:[#allocation2 + $0x1b4] ss:$8 sps:$4 sm:$0xff]   ;;  %v1640_v25 = vld [vmem:[#allocation2 + $0x4] ss:$8 sps:$4 sm:$0xff]   ;;  %v1642_v26 = vld [vmem:[#allocation2] ss:$8 sps:$4 sm:$0xff]  }
  0x1b   :  { %v1580_v27 = vld [vmem:[#allocation2 + $0x1b0] ss:$8 sps:$4 sm:$0xff]   ;;  %v1581_v28 = vld [vmem:[#allocation2 + $0x1c4] ss:$8 sps:$4 sm:$0xff]   ;;  %853 = vmatprep.subr.bf16.mxu1 %v1640_v25  ;;  %v1646_v29 = vld [vmem:[#allocation2 + $0x14] ss:$8 sps:$4 sm:$0xff]  }
  0x1c   :  { %899 = vmatpush1.bf16.msra.mxu0 %v1553_v5  ;;  %854 = vmatpush1.bf16.msra.mxu1 %v1642_v26  ;;  %v1648_v30 = vld [vmem:[#allocation2 + $0x10] ss:$8 sps:$4 sm:$0xff]   ;;  %v1583_v31 = vld [vmem:[#allocation2 + $0x1c0] ss:$8 sps:$4 sm:$0xff]   ;;  %v1584_v32 = vld [vmem:[#allocation2 + $0x1d4] ss:$8 sps:$4 sm:$0xff]  }
  0x1d   :  { %900 = vmatprep.subr.bf16.mxu0 %v1554_v6  ;;  %855 = vmatprep.subr.bf16.mxu1 %v1646_v29  ;;  %v1654_v33 = vld [vmem:[#allocation2 + $0x24] ss:$8 sps:$4 sm:$0xff]   ;;  %v1656_v34 = vld [vmem:[#allocation2 + $0x20] ss:$8 sps:$4 sm:$0xff]   ;;  %v1660_v35 = vld [vmem:[#allocation2 + $0x34] ss:$8 sps:$4 sm:$0xff]  }
  0x1e   :  { %v1586_v36 = vld [vmem:[#allocation2 + $0x1d0] ss:$8 sps:$4 sm:$0xff]   ;;  %v1587_v37 = vld [vmem:[#allocation2 + $0x1e4] ss:$8 sps:$4 sm:$0xff]   ;;  %v1589_v40 = vld [vmem:[#allocation2 + $0x1e0] ss:$8 sps:$4 sm:$0xff]  }
  0x1f   :  { %v1662_v38 = vld [vmem:[#allocation2 + $0x30] ss:$8 sps:$4 sm:$0xff]   ;;  %v1666_v39 = vld [vmem:[#allocation2 + $0x44] ss:$8 sps:$4 sm:$0xff]   ;;  %v1590_v41 = vld [vmem:[#allocation2 + $0x1f4] ss:$8 sps:$4 sm:$0xff]  }
  0x20   :  { %901 = vmatpush1.bf16.msra.mxu0 %v1556_v7  ;;  %856 = vmatpush1.bf16.msra.mxu1 %v1648_v30  ;;  %v1668_v42 = vld [vmem:[#allocation2 + $0x40] ss:$8 sps:$4 sm:$0xff]   ;;  %v1672_v43 = vld [vmem:[#allocation2 + $0x54] ss:$8 sps:$4 sm:$0xff]   ;;  %v1592_v44 = vld [vmem:[#allocation2 + $0x1f0] ss:$8 sps:$4 sm:$0xff]  }
  0x21   :  { %902 = vmatprep.subr.bf16.mxu0 %v1557_v8  ;;  %857 = vmatprep.subr.bf16.mxu1 %v1654_v33  ;;  %v1597_v45 = vld [vmem:[#allocation2 + $0x204] ss:$8 sps:$4 sm:$0xff]   ;;  %v1860_v46 = vld [vmem:[%s1964_s0 + $0x10] sm:$0xff]  ;;  %v1595_v50 = vld [vmem:[#allocation2 + $0x200] ss:$8 sps:$4 sm:$0xff]  }
  0x22   :  { %v1674_v47 = vld [vmem:[#allocation2 + $0x50] ss:$8 sps:$4 sm:$0xff]   ;;  %v1678_v49 = vld [vmem:[#allocation2 + $0x64] ss:$8 sps:$4 sm:$0xff]   ;;  %v1320_v51 = vcombine.high %v1860_v46, %v1860_v46  ;;  %v1600_v52 = vld [vmem:[#allocation2 + $0x214] ss:$8 sps:$4 sm:$0xff]  }
  0x23   :  { %v1680_v53 = vld [vmem:[#allocation2 + $0x60] ss:$8 sps:$4 sm:$0xff]   ;;  %v1684_v54 = vld [vmem:[#allocation2 + $0x74] ss:$8 sps:$4 sm:$0xff]   ;;  %v1598_v55 = vld [vmem:[#allocation2 + $0x210] ss:$8 sps:$4 sm:$0xff]  }
  0x24   :  { %903 = vmatpush1.bf16.msra.mxu0 %v1559_v9  ;;  %858 = vmatpush1.bf16.msra.mxu1 %v1656_v34  ;;  %v1603_v56 = vld [vmem:[#allocation2 + $0x224] ss:$8 sps:$4 sm:$0xff]   ;;  %v1686_v57 = vld [vmem:[#allocation2 + $0x70] ss:$8 sps:$4 sm:$0xff]   ;;  %v1601_v59 = vld [vmem:[#allocation2 + $0x220] ss:$8 sps:$4 sm:$0xff]  }
  0x25   :  { %904 = vmatprep.subr.bf16.mxu0 %v1560_v10  ;;  %859 = vmatprep.subr.bf16.mxu1 %v1660_v35  ;;  %v1690_v58 = vld [vmem:[#allocation2 + $0x84] ss:$8 sps:$4 sm:$0xff]   ;;  %v1606_v60 = vld [vmem:[#allocation2 + $0x234] ss:$8 sps:$4 sm:$0xff]   ;;  %v1692_v61 = vld [vmem:[#allocation2 + $0x80] ss:$8 sps:$4 sm:$0xff]  }
  0x26   :  { %v1696_v62 = vld [vmem:[#allocation2 + $0x94] ss:$8 sps:$4 sm:$0xff]   ;;  %v1604_v63 = vld [vmem:[#allocation2 + $0x230] ss:$8 sps:$4 sm:$0xff]   ;;  %v1609_v0 = vld [vmem:[#allocation2 + $0x244] ss:$8 sps:$4 sm:$0xff]  }
  0x27   :  { %v1698_v1 = vld [vmem:[#allocation2 + $0x90] ss:$8 sps:$4 sm:$0xff]   ;;  %v1702_v2 = vld [vmem:[#allocation2 + $0xa4] ss:$8 sps:$4 sm:$0xff]   ;;  %v1607_v3 = vld [vmem:[#allocation2 + $0x240] ss:$8 sps:$4 sm:$0xff]  }
  0x28   :  { %905 = vmatpush1.bf16.msra.mxu0 %v1562_v11  ;;  %860 = vmatpush1.bf16.msra.mxu1 %v1662_v38  ;;  %v1612_v4 = vld [vmem:[#allocation2 + $0x254] ss:$8 sps:$4 sm:$0xff]   ;;  %v1704_v5 = vld [vmem:[#allocation2 + $0xa0] ss:$8 sps:$4 sm:$0xff]   ;;  %v1610_v7 = vld [vmem:[#allocation2 + $0x250] ss:$8 sps:$4 sm:$0xff]  }
  0x29   :  { %906 = vmatprep.subr.bf16.mxu0 %v1563_v12  ;;  %861 = vmatprep.subr.bf16.mxu1 %v1666_v39  ;;  %v1708_v6 = vld [vmem:[#allocation2 + $0xb4] ss:$8 sps:$4 sm:$0xff]   ;;  %v1615_v8 = vld [vmem:[#allocation2 + $0x264] ss:$8 sps:$4 sm:$0xff]   ;;  %v1710_v10 = vld [vmem:[#allocation2 + $0xb0] ss:$8 sps:$4 sm:$0xff]  }
  0x2a   :  { %v41_v9 = vld [vmem:[%s1964_s0] sm:$0xff]  ;;  %v1618_v14 = vld [vmem:[#allocation2 + $0x274] ss:$8 sps:$4 sm:$0xff]   ;;  %v1622_v25 = vld [vmem:[#allocation2 + $0x290] ss:$8 sps:$4 sm:$0xff]  }
  0x2b   :  { %v1316_v11 = vcombine.high %v41_v9, %v41_v9  ;;  %v1714_v12 = vld [vmem:[#allocation2 + $0xc4] ss:$8 sps:$4 sm:$0xff]   ;;  %v1613_v13 = vld [vmem:[#allocation2 + $0x260] ss:$8 sps:$4 sm:$0xff]   ;;  %v1630_v30 = vld [vmem:[#allocation2 + $0x2b4] ss:$8 sps:$4 sm:$0xff]  }
  0x2c   :  { %907 = vmatpush1.bf16.msra.mxu0 %v1565_v15  ;;  %862 = vmatpush1.bf16.msra.mxu1 %v1668_v42  ;;  %v1716_v15 = vld [vmem:[#allocation2 + $0xc0] ss:$8 sps:$4 sm:$0xff]   ;;  %v1627_v26 = vld [vmem:[#allocation2 + $0x2a4] ss:$8 sps:$4 sm:$0xff]   ;;  %v1628_v34 = vld [vmem:[#allocation2 + $0x2b0] ss:$8 sps:$4 sm:$0xff]  }
  0x2d   :  { %908 = vmatprep.subr.bf16.mxu0 %v1566_v16  ;;  %863 = vmatprep.subr.bf16.mxu1 %v1672_v43  ;;  %v1720_v16 = vld [vmem:[#allocation2 + $0xd4] ss:$8 sps:$4 sm:$0xff]   ;;  %v1625_v29 = vld [vmem:[#allocation2 + $0x2a0] ss:$8 sps:$4 sm:$0xff]   ;;  %v1633_v35 = vld [vmem:[#allocation2 + $0x2c4] ss:$8 sps:$4 sm:$0xff]  }
  0x2e   :  { %885 = vmatprep.mubr.bf16.mxu1 %v1316_v11  ;;  %v1747_v33 = vld [vmem:[%s1967_s3 + $0x48] sm:$0xff]   ;;  %v1636_v39 = vld [vmem:[#allocation2 + $0x2d4] ss:$8 sps:$4 sm:$0xff]   ;;  %v1634_v42 = vld [vmem:[#allocation2 + $0x2d0] ss:$8 sps:$4 sm:$0xff]  }
  0x2f   :  { %v1631_v38 = vld [vmem:[#allocation2 + $0x2c0] ss:$8 sps:$4 sm:$0xff]   ;;  %v1639_v43 = vld [vmem:[#allocation2 + $0x2e4] ss:$8 sps:$4 sm:$0xff]   ;;  %v1719_v11 = vld [vmem:[#allocation2 + $0x3b4] ss:$8 sps:$4 sm:$0xff]  }
  0x30   :  { %909 = vmatpush1.bf16.msra.mxu0 %v1568_v17  ;;  %864 = vmatpush1.bf16.msra.mxu1 %v1674_v47  ;;  %v1616_v17 = vld [vmem:[#allocation2 + $0x270] ss:$8 sps:$4 sm:$0xff]   ;;  %v1637_v47 = vld [vmem:[#allocation2 + $0x2e0] ss:$8 sps:$4 sm:$0xff]  }
  0x31   :  { %910 = vmatprep.subr.bf16.mxu0 %v1569_v18  ;;  %865 = vmatprep.subr.bf16.mxu1 %v1678_v49  ;;  %v1621_v18 = vld [vmem:[#allocation2 + $0x284] ss:$8 sps:$4 sm:$0xff]  }
  0x32   :  { %v1754_v49 = vld [vmem:[%s1967_s3 + $0x20] sm:$0xff]  }
  0x34   :  { %911 = vmatpush1.bf16.msra.mxu0 %v1571_v19  ;;  %866 = vmatpush1.bf16.msra.mxu1 %v1680_v53  ;;  %v1619_v19 = vld [vmem:[#allocation2 + $0x280] ss:$8 sps:$4 sm:$0xff]   ;;  %v1319_v53 = vcombine.low %v1860_v46, %v1860_v46  ;;  %v1677_v46 = vld [vmem:[#allocation2 + $0x344] ss:$8 sps:$4 sm:$0xff]  }
  0x35   :  { %912 = vmatprep.subr.bf16.mxu0 %v1572_v20  ;;  %867 = vmatprep.subr.bf16.mxu1 %v1684_v54  ;;  %v1722_v20 = vld [vmem:[#allocation2 + $0xd0] ss:$8 sps:$4 sm:$0xff]   ;;  %v1651_v54 = vld [vmem:[#allocation2 + $0x300] ss:$8 sps:$4 sm:$0xff]  }
  0x38   :  { %913 = vmatpush1.bf16.msra.mxu0 %v1574_v21  ;;  %868 = vmatpush1.bf16.msra.mxu1 %v1686_v57  ;;  %v1726_v21 = vld [vmem:[#allocation2 + $0xe4] ss:$8 sps:$4 sm:$0xff]   ;;  %v1657_v57 = vld [vmem:[#allocation2 + $0x310] ss:$8 sps:$4 sm:$0xff]  }
  0x39   :  { %914 = vmatprep.subr.bf16.mxu0 %v1575_v22  ;;  %869 = vmatprep.subr.bf16.mxu1 %v1690_v58  ;;  %v1624_v22 = vld [vmem:[#allocation2 + $0x294] ss:$8 sps:$4 sm:$0xff]   ;;  %v1665_v58 = vld [vmem:[#allocation2 + $0x324] ss:$8 sps:$4 sm:$0xff]  }
  0x3c   :  { %915 = vmatpush1.bf16.msra.mxu0 %v1577_v23  ;;  %870 = vmatpush1.bf16.msra.mxu1 %v1692_v61  ;;  %v1728_v23 = vld [vmem:[#allocation2 + $0xe0] ss:$8 sps:$4 sm:$0xff]   ;;  %v1669_v61 = vld [vmem:[#allocation2 + $0x330] ss:$8 sps:$4 sm:$0xff]  }
  0x3d   :  { %916 = vmatprep.subr.bf16.mxu0 %v1578_v24  ;;  %871 = vmatprep.subr.bf16.mxu1 %v1696_v62  ;;  %v1732_v24 = vld [vmem:[#allocation2 + $0xf4] ss:$8 sps:$4 sm:$0xff]   ;;  %v1675_v62 = vld [vmem:[#allocation2 + $0x340] ss:$8 sps:$4 sm:$0xff]  }
  0x40   :  { %917 = vmatpush1.bf16.msra.mxu0 %v1580_v27  ;;  %872 = vmatpush1.bf16.msra.mxu1 %v1698_v1  ;;  %v1734_v27 = vld [vmem:[#allocation2 + $0xf0] ss:$8 sps:$4 sm:$0xff]   ;;  %v1689_v1 = vld [vmem:[#allocation2 + $0x364] ss:$8 sps:$4 sm:$0xff]  }
  0x41   :  { %918 = vmatprep.subr.bf16.mxu0 %v1581_v28  ;;  %873 = vmatprep.subr.bf16.mxu1 %v1702_v2  ;;  %v1745_v28 = vld [vmem:[%s1967_s3 + $0x40] sm:$0xff]  }
  0x42   :  { %v1687_v2 = vld [vmem:[#allocation2 + $0x360] ss:$8 sps:$4 sm:$0xff]  }
  0x44   :  { %919 = vmatpush1.bf16.msra.mxu0 %v1583_v31  ;;  %874 = vmatpush1.bf16.msra.mxu1 %v1704_v5  ;;  %v1746_v31 = vld [vmem:[%s1967_s3] sm:$0xff]  }
  0x45   :  { %920 = vmatprep.subr.bf16.mxu0 %v1584_v32  ;;  %875 = vmatprep.subr.bf16.mxu1 %v1708_v6  ;;  %v1315_v32 = vcombine.low %v41_v9, %v41_v9  ;;  %v1701_v5 = vld [vmem:[#allocation2 + $0x384] ss:$8 sps:$4 sm:$0xff]   ;;  %v1699_v6 = vld [vmem:[#allocation2 + $0x380] ss:$8 sps:$4 sm:$0xff]  }
  0x46   :  { %v1713_v9 = vld [vmem:[#allocation2 + $0x3a4] ss:$8 sps:$4 sm:$0xff]  }
  0x48   :  { %921 = vmatpush1.bf16.msra.mxu0 %v1586_v36  ;;  %876 = vmatpush1.bf16.msra.mxu1 %v1710_v10  ;;  %v1748_v36 = vld [vmem:[%s1967_s3 + $0x8] sm:$0xff]  }
  0x49   :  { %922 = vmatprep.subr.bf16.mxu0 %v1587_v37  ;;  %877 = vmatprep.subr.bf16.mxu1 %v1714_v12  ;;  %v1749_v37 = vld [vmem:[%s1967_s3 + $0x50] sm:$0xff]   ;;  %v1711_v10 = vld [vmem:[#allocation2 + $0x3a0] ss:$8 sps:$4 sm:$0xff]  }
  0x4a   :  { %v1717_v12 = vld [vmem:[#allocation2 + $0x3b0] ss:$8 sps:$4 sm:$0xff]  }
  0x4c   :  { %923 = vmatpush1.bf16.msra.mxu0 %v1589_v40  ;;  %878 = vmatpush1.bf16.msra.mxu1 %v1716_v15  ;;  %v1750_v40 = vld [vmem:[%s1967_s3 + $0x10] sm:$0xff]  }
  0x4d   :  { %924 = vmatprep.subr.bf16.mxu0 %v1590_v41  ;;  %879 = vmatprep.subr.bf16.mxu1 %v1720_v16  ;;  %v1751_v41 = vld [vmem:[%s1967_s3 + $0x58] sm:$0xff]  }
  0x4e   :  { %v1731_v15 = vld [vmem:[#allocation2 + $0x3d4] ss:$8 sps:$4 sm:$0xff]   ;;  %v1729_v16 = vld [vmem:[#allocation2 + $0x3d0] ss:$8 sps:$4 sm:$0xff]  }
  0x50   :  { %925 = vmatpush1.bf16.msra.mxu0 %v1592_v44  ;;  %880 = vmatpush1.bf16.msra.mxu1 %v1722_v20  ;;  %v1752_v44 = vld [vmem:[%s1967_s3 + $0x18] sm:$0xff]  }
  0x51   :  { %935 = vmatprep.subr.bf16.mxu0 %v1597_v45  ;;  %881 = vmatprep.subr.bf16.mxu1 %v1726_v21  ;;  %v1753_v45 = vld [vmem:[%s1967_s3 + $0x60] sm:$0xff]   ;;  %v1740_v20 = vld [vmem:[#allocation2 + $0x3f0] ss:$8 sps:$4 sm:$0xff]  }
  0x53   :  { %927 = vmatmul.mubr.bf16.vlgmr.msra.gmra.mrb[0].mxu0 %v1317_v48  ;;  %v1645_v48 = vld [vmem:[#allocation2 + $0x2f4] ss:$8 sps:$4 sm:$0xff]  }
  0x54   :  { %936 = vmatpush1.bf16.msra.mxu0 %v1595_v50  ;;  %967 = vmatprep.mubr.bf16.mxu0 %v1320_v51  ;;  %v1643_v50 = vld [vmem:[#allocation2 + $0x2f0] ss:$8 sps:$4 sm:$0xff]   ;;  %v1653_v51 = vld [vmem:[#allocation2 + $0x304] ss:$8 sps:$4 sm:$0xff]  }
  0x55   :  { %937 = vmatprep.subr.bf16.mxu0 %v1600_v52  ;;  %882 = vmatpush1.bf16.msra.mxu1 %v1728_v23  ;;  %v1902_v52 = vld [vmem:[%s1964_s0 + $0x18] sm:$0xff]  ;;  %v1756_v23 = vld [vmem:[%s1967_s3 + $0x28] sm:$0xff]  }
  0x56   :  { %883 = vmatprep.subr.bf16.mxu1 %v1732_v24  ;;  %v1321_v21 = vcombine.low %v1902_v52, %v1902_v52  ;;  %v1757_v24 = vld [vmem:[%s1967_s3 + $0x70] sm:$0xff]  }
  0x58   :  { %938 = vmatpush1.bf16.msra.mxu0 %v1598_v55  ;;  %v1322_v55 = vcombine.high %v1902_v52, %v1902_v52  ;;  %v1761_v52 = vld [vmem:[%s1969_s5] sm:$0xff]  }
  0x59   :  { %939 = vmatprep.subr.bf16.mxu0 %v1603_v56  ;;  %884 = vmatpush1.bf16.msra.mxu1 %v1734_v27  ;;  %v1659_v56 = vld [vmem:[#allocation2 + $0x314] ss:$8 sps:$4 sm:$0xff]  }
  0x5a   :  { %1477 = vmatprep.subr.bf16.mxu1 %v1745_v28  ;;  %v1760_v27 = vld [vmem:[%s1967_s3 + $0x38] sm:$0xff]   ;;  %v1796_v28 = vmov 0.0  }
  0x5c   :  { %940 = vmatpush1.bf16.msra.mxu0 %v1601_v59  ;;  %886 = vmatmul.mubr.bf16.vlgmr.msra.gmra.mrb[0].mxu1 %v1315_v32  ;;  %v1663_v59 = vld [vmem:[#allocation2 + $0x320] ss:$8 sps:$4 sm:$0xff]  }
  0x5d   :  { %941 = vmatprep.subr.bf16.mxu0 %v1606_v60  ;;  %1478 = vmatpush3.bf16.msra.mxu1 %v1746_v31  ;;  %v1671_v60 = vld [vmem:[#allocation2 + $0x334] ss:$8 sps:$4 sm:$0xff]  }
  0x5e   :  { %1479 = vmatprep.subr.bf16.mxu1 %v1747_v33  ;;  %v175_v33 = vlaneseq }
  0x60   :  { %942 = vmatpush1.bf16.msra.mxu0 %v1604_v63  ;;  %v1683_v63 = vld [vmem:[#allocation2 + $0x354] ss:$8 sps:$4 sm:$0xff]  }
  0x61   :  { %943 = vmatprep.subr.bf16.mxu0 %v1609_v0  ;;  %1480 = vmatpush3.bf16.msra.mxu1 %v1748_v36  ;;  %v1681_v0 = vld [vmem:[#allocation2 + $0x350] ss:$8 sps:$4 sm:$0xff]   ;;  %v173_v36 = vld [vmem:[%s1966_s2] sm:$0x3] }
  0x62   :  { %1481 = vmatprep.subr.bf16.mxu1 %v1749_v37 }
  0x64   :  { %944 = vmatpush1.bf16.msra.mxu0 %v1607_v3  ;;  %v1695_v3 = vld [vmem:[#allocation2 + $0x374] ss:$8 sps:$4 sm:$0xff]  }
  0x65   :  { %945 = vmatprep.subr.bf16.mxu0 %v1612_v4  ;;  %1482 = vmatpush3.bf16.msra.mxu1 %v1750_v40  ;;  %v1693_v4 = vld [vmem:[#allocation2 + $0x370] ss:$8 sps:$4 sm:$0xff]  }
  0x66   :  { %1483 = vmatprep.subr.bf16.mxu1 %v1751_v41 }
  0x68   :  { %946 = vmatpush1.bf16.msra.mxu0 %v1610_v7  ;;  %v1707_v7 = vld [vmem:[#allocation2 + $0x394] ss:$8 sps:$4 sm:$0xff]  }
  0x69   :  { %947 = vmatprep.subr.bf16.mxu0 %v1615_v8  ;;  %1484 = vmatpush3.bf16.msra.mxu1 %v1752_v44  ;;  %v1705_v8 = vld [vmem:[#allocation2 + $0x390] ss:$8 sps:$4 sm:$0xff]  }
  0x6a   :  { %1485 = vmatprep.subr.bf16.mxu1 %v1753_v45 }
  0x6c   :  { %948 = vmatpush1.bf16.msra.mxu0 %v1613_v13  ;;  %v1725_v13 = vld [vmem:[#allocation2 + $0x3c4] ss:$8 sps:$4 sm:$0xff]  }
  0x6d   :  { %949 = vmatprep.subr.bf16.mxu0 %v1618_v14  ;;  %1486 = vmatpush3.bf16.msra.mxu1 %v1754_v49  ;;  %v1723_v14 = vld [vmem:[#allocation2 + $0x3c0] ss:$8 sps:$4 sm:$0xff]  }
  0x70   :  { %950 = vmatpush1.bf16.msra.mxu0 %v1616_v17  ;;  %v1737_v17 = vld [vmem:[#allocation2 + $0x3e4] ss:$8 sps:$4 sm:$0xff]  }
  0x71   :  { %951 = vmatprep.subr.bf16.mxu0 %v1621_v18  ;;  %v1735_v18 = vld [vmem:[#allocation2 + $0x3e0] ss:$8 sps:$4 sm:$0xff]  }
  0x74   :  { %952 = vmatpush1.bf16.msra.mxu0 %v1619_v19  ;;  %v1742_v19 = vld [vmem:[#allocation2 + $0x3f4] ss:$8 sps:$4 sm:$0xff]  }
  0x75   :  { %953 = vmatprep.subr.bf16.mxu0 %v1624_v22  ;;  %v1755_v22 = vld [vmem:[%s1967_s3 + $0x68] sm:$0xff]  }
  0x76   :  { %1487 = vmatprep.subr.bf16.mxu1 %v1755_v22 }
  0x77   :  { %1488 = vmatpush3.bf16.msra.mxu1 %v1756_v23 }
  0x78   :  { %954 = vmatpush1.bf16.msra.mxu0 %v1622_v25  ;;  %v1758_v25 = vld [vmem:[%s1967_s3 + $0x30] sm:$0xff]   ;;  %1489 = vmatprep.subr.bf16.mxu1 %v1757_v24 }
  0x79   :  { %955 = vmatprep.subr.bf16.mxu0 %v1627_v26  ;;  %v1759_v26 = vld [vmem:[%s1967_s3 + $0x78] sm:$0xff]  }
  0x7b   :  { %1490 = vmatpush3.bf16.msra.mxu1 %v1758_v25 }
  0x7c   :  { %956 = vmatpush1.bf16.msra.mxu0 %v1625_v29  ;;  %1491 = vmatprep.subr.bf16.mxu1 %v1759_v26 }
  0x7d   :  { %957 = vmatprep.subr.bf16.mxu0 %v1630_v30 }
  0x7f   :  { %1492 = vmatpush3.bf16.msra.mxu1 %v1760_v27 }
  0x80   :  { %958 = vmatpush1.bf16.msra.mxu0 %v1628_v34  ;;  %1508 = vmatprep.subr.bf16.mxu1 %v1796_v28  ;;  %v176_v34 = vshrl.u32 %v175_v33, 7 }
  0x81   :  { %959 = vmatprep.subr.bf16.mxu0 %v1633_v35 }
  0x82   :  { %v177_v35 = vsub.s32 0, %v176_v34  ;;  %v181_v37 = vsub.s32 1, %v176_v34 }
  0x84   :  { %960 = vmatpush1.bf16.msra.mxu0 %v1631_v38  ;;  %v178_v38 = vrot.slane %v173_v36, %v177_v35 }
  0x85   :  { %961 = vmatprep.subr.bf16.mxu0 %v1636_v39  ;;  %v182_v39 = vrot.slane %v173_v36, %v181_v37 }
  0x88   :  { %962 = vmatpush1.bf16.msra.mxu0 %v1634_v42 }
  0x89   :  { %963 = vmatprep.subr.bf16.mxu0 %v1639_v43 }
  0x8c   :  { %964 = vmatpush1.bf16.msra.mxu0 %v1637_v47 }
  0x8d   :  { %965 = vmatprep.subr.bf16.mxu0 %v1645_v48 }
  0x90   :  { %966 = vmatpush1.bf16.msra.mxu0 %v1643_v50 }
  0x91   :  { %976 = vmatprep.subr.bf16.mxu0 %v1653_v51 }
  0x93   :  { %968 = vmatmul.mubr.bf16.vlgmr.msra.gmra.mrb[0].mxu0 %v1319_v53 }
  0x94   :  { %977 = vmatpush1.bf16.msra.mxu0 %v1651_v54  ;;  %1008 = vmatprep.mubr.bf16.mxu0 %v1322_v55  ;;  %v1762_v54 = vld [vmem:[%s1969_s5 + $0x8] sm:$0xff]   ;;  %v1763_v55 = vld [vmem:[%s1969_s5 + $0x10] sm:$0xff]  }
  0x95   :  { %978 = vmatprep.subr.bf16.mxu0 %v1659_v56  ;;  %v1764_v56 = vld [vmem:[%s1969_s5 + $0x18] sm:$0xff]  }
  0x98   :  { %979 = vmatpush1.bf16.msra.mxu0 %v1657_v57  ;;  %v1765_v57 = vld [vmem:[%s1969_s5 + $0x20] sm:$0xff]  }
  0x99   :  { %980 = vmatprep.subr.bf16.mxu0 %v1665_v58  ;;  %v1766_v58 = vld [vmem:[%s1969_s5 + $0x28] sm:$0xff]  }
  0x9c   :  { %981 = vmatpush1.bf16.msra.mxu0 %v1663_v59  ;;  %v1767_v59 = vld [vmem:[%s1969_s5 + $0x30] sm:$0xff]  }
  0x9d   :  { %982 = vmatprep.subr.bf16.mxu0 %v1671_v60  ;;  %v1768_v60 = vld [vmem:[%s1969_s5 + $0x38] sm:$0xff]  }
  0xa0   :  { %983 = vmatpush1.bf16.msra.mxu0 %v1669_v61 }
  0xa1   :  { %984 = vmatprep.subr.bf16.mxu0 %v1677_v46  ;;  %v1451_v46 = vld [vmem:[%s1968_s4] ss:$0 sm:$0xff] }
  0xa4   :  { %985 = vmatpush1.bf16.msra.mxu0 %v1675_v62 }
  0xa5   :  { %986 = vmatprep.subr.bf16.mxu0 %v1683_v63 }
  0xa8   :  { %987 = vmatpush1.bf16.msra.mxu0 %v1681_v0 }
  0xa9   :  { %988 = vmatprep.subr.bf16.mxu0 %v1689_v1 }
  0xac   :  { %989 = vmatpush1.bf16.msra.mxu0 %v1687_v2 }
  0xad   :  { %990 = vmatprep.subr.bf16.mxu0 %v1695_v3 }
  0xb0   :  { %991 = vmatpush1.bf16.msra.mxu0 %v1693_v4 }
  0xb1   :  { %992 = vmatprep.subr.bf16.mxu0 %v1701_v5  ;;  %v1468_v5 = vld [vmem:[%s1970_s6] ss:$0 sm:$0xff] }
  0xb4   :  { %993 = vmatpush1.bf16.msra.mxu0 %v1699_v6 }
  0xb5   :  { %994 = vmatprep.subr.bf16.mxu0 %v1707_v7 }
  0xb8   :  { %995 = vmatpush1.bf16.msra.mxu0 %v1705_v8 }
  0xb9   :  { %996 = vmatprep.subr.bf16.mxu0 %v1713_v9 }
  0xbc   :  { %997 = vmatpush1.bf16.msra.mxu0 %v1711_v10 }
  0xbd   :  { %998 = vmatprep.subr.bf16.mxu0 %v1719_v11 }
  0xc0   :  { %999 = vmatpush1.bf16.msra.mxu0 %v1717_v12 }
  0xc1   :  { %1000 = vmatprep.subr.bf16.mxu0 %v1725_v13 }
  0xc4   :  { %1001 = vmatpush1.bf16.msra.mxu0 %v1723_v14 }
  0xc5   :  { %1002 = vmatprep.subr.bf16.mxu0 %v1731_v15 }
  0xc8   :  { %1003 = vmatpush1.bf16.msra.mxu0 %v1729_v16 }
  0xc9   :  { %1004 = vmatprep.subr.bf16.mxu0 %v1737_v17 }
  0xcc   :  { %1005 = vmatpush1.bf16.msra.mxu0 %v1735_v18 }
  0xcd   :  { %1006 = vmatprep.subr.bf16.mxu0 %v1742_v19 }
  0xd0   :  { %1007 = vmatpush1.bf16.msra.mxu0 %v1740_v20 }
  0xd3   :  { %1009 = vmatmul.mubr.bf16.vlgmr.msra.gmra.mrb[0].mxu0 %v1321_v21 }
 0x12f   :  { %v887_v29 = vpop.f32.mrb[0].mxu1 }
 0x130   :  { %v889_v30 = vpop.f32.mrb[1].mxu1  ;;  %v888_v40 = vadd.f32 %v887_v29, %v178_v38 }
 0x131   :  { %v891_v31 = vpop.f32.mrb[2].mxu1  ;;  %v890_v41 = vadd.f32 %v889_v30, %v182_v39 }
 0x132   :  { %v892_v32 = vpop.f32.mrb[3].mxu1 }
 0x1a6   :  { %v1010_v42 = vpop.f32.mrb[0].mxu0 }
 0x1a7   :  { %v1529_v43 = vadd.f32 %v1010_v42, %v888_v40  ;;  %v1012_v44 = vpop.f32.mrb[1].mxu0 }
 0x1a8   :  { %v1531_v45 = vadd.f32 %v1012_v44, %v890_v41  ;;  %v1014_v47 = vpop.f32.mrb[2].mxu0 }
 0x1a9   :  { %v1017_v48 = vmax.f32 %v1529_v43, 0.0  ;;  %v1015_v49 = vpop.f32.mrb[3].mxu0 }
 0x1aa   :  { %v1018_v50 = vmax.f32 %v1531_v45, 0.0 }
 0x1ab   :  { %v1019_v53 = vpack.c.bf16 %v1017_v48, %v1017_v48 }
 0x1ac   :  { %v1020_v51 = vpack.c.bf16 %v1018_v50, %v1018_v50 }
 0x1ae   :  { %1188 = vmatprep.mubr.bf16.mxu1 %v1020_v51 }
 0x1af   :  { %1189 = vmatmul.mubr.bf16.vlgmr.msra.gmra.mrb[4].mxu1 %v1019_v53 }
 0x1b0   :  { %1509 = vmatpush3.bf16.msra.mxu1 %v1761_v52  ;;  %1524 = vmatprep.mubr.msk.bf16.mxu1 %vm1797_vm0, %v1796_v28 }
 0x1b1   :  { %1510 = vmatprep.subr.bf16.mxu1 %v1796_v28 }
 0x1b4   :  { %1511 = vmatpush3.bf16.msra.mxu1 %v1762_v54 }
 0x1b5   :  { %1512 = vmatprep.subr.bf16.mxu1 %v1796_v28 }
 0x1b8   :  { %1513 = vmatpush3.bf16.msra.mxu1 %v1763_v55 }
 0x1b9   :  { %1514 = vmatprep.subr.bf16.mxu1 %v1796_v28 }
 0x1bc   :  { %1515 = vmatpush3.bf16.msra.mxu1 %v1764_v56 }
 0x1bd   :  { %1516 = vmatprep.subr.bf16.mxu1 %v1796_v28 }
 0x1c0   :  { %1517 = vmatpush3.bf16.msra.mxu1 %v1765_v57 }
 0x1c1   :  { %1518 = vmatprep.subr.bf16.mxu1 %v1796_v28 }
 0x1c4   :  { %1519 = vmatpush3.bf16.msra.mxu1 %v1766_v58 }
 0x1c5   :  { %1520 = vmatprep.subr.bf16.mxu1 %v1796_v28 }
 0x1c8   :  { %1521 = vmatpush3.bf16.msra.mxu1 %v1767_v59 }
 0x1c9   :  { %1522 = vmatprep.subr.bf16.mxu1 %v1796_v28 }
 0x1cc   :  { %1523 = vmatpush3.bf16.msra.mxu1 %v1768_v60 }
 0x282   :  { %v1493_v61 = vpop.f32.mrb[4].mxu1 }
 0x283   :  { %v1494_v62 = vpop.f32.mrb[5].mxu1 }
 0x284   :  { %v1495_v63 = vadd.f32 %v1494_v62, %v1493_v61  ;;  %v1496_v0 = vpop.f32.mrb[6].mxu1 }
 0x285   :  { %v1497_v1 = vpop.f32.mrb[7].mxu1 }
 0x286   :  { %v1191_v2 = vadd.f32 %v1495_v63, %v1451_v46 }
 0x288   :  { %v1196_v3 = vmax.f32 %v1191_v2, 0.0 }
 0x28a   :  { %v1197_v4 = vpack.c.bf16 %v1196_v3, %v1196_v3 }
 0x28c   :  { %1525 = vmatmul.mubr.bf16.vlgmr.msra.gmra.mrb[8].mxu1 %v1197_v4 }
 0x35f   :  { %v1303_v6 = vpop.f32.mrb[8].mxu1 }
 0x360   :  { %v1304_v7 = vadd.f32 %v1468_v5, %v1303_v6  ;;  %v1526_v8 = vpop.f32.mrb[9].mxu1 }
 0x361   :  { %v1306_v9 = vpop.f32.mrb[10].mxu1 }
 0x362   :  { %1309 = vst [vmem:[%s1971_s7] sm:$0xff] %v1304_v7  ;;  %v1527_v10 = vpop.f32.mrb[11].mxu1 }
 0x363   :  { %1314 = vsyncpa [#allocation3], 1 }

</bundles_post_ra>
